<compile_context>
chip_gen: v5e
topology: v5e:2x2
jax: 0.10.0
libtpu: 0.0.40
codegen_flags: <defaults>
</compile_context>

<pallas_src>
import functools

import jax
import jax.numpy as jnp
from jax import lax
from jax.experimental import pallas as pl
from jax.experimental.pallas import tpu as pltpu

LN = 128                 # rays per lane row
CH = 8                   # sublane rows per inner-loop chunk (one vreg per quantity)
NCORES = 2               # leading "parallel" grid axis (v7x megacore; harmless on 1-TC chips)
NSTATS = 14              # partial sums produced by the main kernel
NROWS = 25               # packed channel rows

_MAX_TILE_ROWS = 512             # cap on sublane rows per tile
_TILE_BYTES = 6 * 1024 * 1024    # target bytes per pipeline input buffer
_VMEM_LIMIT = 32 * 1024 * 1024   # explicit scoped-VMEM budget (safe on v5e/v6e/v7x)

# Packed channel-row indices.
R_VALID, R_IMASK, R_IW, R_DGT = 0, 1, 2, 3
R_DC, R_DF, R_DIC, R_DIF = 4, 5, 6, 7
R_OPC, R_OPF = 8, 9
R_RGB_GT, R_RGB_C, R_RGB_F, R_RGB_IC, R_RGB_IF = 10, 13, 16, 19, 22


def _round_up(x, m):
    return ((x + m - 1) // m) * m


def _tile_rows(channels, g, max_rows):
    """Sublane rows per tile + padded row count for a (channels, g, 128) array."""
    by_budget = _TILE_BYTES // (channels * LN * 4)
    per_core = _round_up(max(1, -(-g // NCORES)), CH)
    tr = min(max_rows, by_budget, per_core)
    tr = max(CH, (tr // CH) * CH)
    g_pad = _round_up(g, NCORES * tr)
    return tr, g_pad


def _to_lane_blocks(x_2d, g_pad):
    """(C, N) -> zero-padded, lane-dense (C, g_pad, 128)."""
    c, n = x_2d.shape
    pad = g_pad * LN - n
    if pad:
        x_2d = jnp.pad(x_2d, ((0, 0), (0, pad)))
    return x_2d.reshape(c, g_pad, LN)


# ---------------------------------------------------------------------------
# Main kernel: 14 masked partial sums over all rays.
# ---------------------------------------------------------------------------
def _main_stats_kernel(p_ref, out_ref, acc_ref):
    k = pl.program_id(1)

    @pl.when(k == 0)
    def _init():
        acc_ref[...] = jnp.zeros_like(acc_ref)

    n_chunks = p_ref.shape[1] // CH

    def body(j, carry):
        off = pl.multiple_of(j * CH, CH)
        ld = lambda r: p_ref[r, pl.ds(off, CH), :]          # (CH, 128) per quantity

        v = ld(R_VALID)
        im = ld(R_IMASK)
        w = ld(R_IW)
        d = ld(R_DGT)

        dpos = (d > 0.0).astype(jnp.float32)
        dm = v * dpos            # depth mask
        vim = v * im             # instance color mask
        idm = dm * im            # instance depth mask
        vw = v * w               # hoisted mask products
        vimw = vim * w
        idmw = idm * w

        gt = [ld(R_RGB_GT + c) for c in range(3)]

        def rgb_sq(base):
            s = None
            for c in range(3):
                dlt = ld(base + c) - gt[c]
                s = dlt * dlt if s is None else s + dlt * dlt
            return s

        sq_cc = rgb_sq(R_RGB_C)
        sq_cf = rgb_sq(R_RGB_F)
        sq_ic = rgb_sq(R_RGB_IC)
        sq_if = rgb_sq(R_RGB_IF)

        ddc = ld(R_DC) - d
        ddf = ld(R_DF) - d
        ddic = ld(R_DIC) - d
        ddif = ld(R_DIF) - d

        opc = jnp.clip(ld(R_OPC), 0.0, 1.0) - im
        opf = jnp.clip(ld(R_OPF), 0.0, 1.0) - im

        stats = (
            v,                    # 0: sum(valid)
            v * sq_cc,            # 1: color coarse numerator
            v * sq_cf,            # 2: color fine numerator
            dm,                   # 3: sum(depth mask)
            dm * ddc * ddc,       # 4: depth coarse numerator
            dm * ddf * ddf,       # 5: depth fine numerator
            vw * opc * opc,       # 6: opacity coarse numerator
            vw * opf * opf,       # 7: opacity fine numerator
            vim,                  # 8: sum(instance color mask)
            vimw * sq_ic,         # 9: instance color coarse numerator
            vimw * sq_if,         # 10: instance color fine numerator
            idm,                  # 11: sum(instance depth mask)
            idmw * ddic * ddic,   # 12: instance depth coarse numerator
            idmw * ddif * ddif,   # 13: instance depth fine numerator
        )
        for s_idx, s_val in enumerate(stats):
            acc_ref[s_idx] += s_val
        return carry

    lax.fori_loop(0, n_chunks, body, 0)

    @pl.when(k == pl.num_programs(1) - 1)
    def _fin():
        # Single cross-sublane reduction + one lane-dense store per core.
        out_ref[0] = jnp.sum(acc_ref[...], axis=1)          # (NSTATS, 128)


def _main_stats(packed, max_rows):
    """packed: (NROWS, N) f32.  Returns (NSTATS,) f32 sums over all N rays."""
    n = packed.shape[1]
    g = -(-n // LN)
    tr, g_pad = _tile_rows(NROWS, g, max_rows)
    k_steps = g_pad // (NCORES * tr)
    blocks = _to_lane_blocks(packed, g_pad)

    out = pl.pallas_call(
        _main_stats_kernel,
        out_shape=jax.ShapeDtypeStruct((NCORES, NSTATS, LN), jnp.float32),
        grid=(NCORES, k_steps),
        in_specs=[pl.BlockSpec((NROWS, tr, LN),
                               lambda c, k: (0, c * k_steps + k, 0))],
        out_specs=pl.BlockSpec((1, NSTATS, LN), lambda c, k: (c, 0, 0)),
        scratch_shapes=[pltpu.VMEM((NSTATS, CH, LN), jnp.float32)],
        compiler_params=pltpu.CompilerParams(
            dimension_semantics=("parallel", "arbitrary"),
            vmem_limit_bytes=_VMEM_LIMIT),
    )(blocks)
    return jnp.sum(out, axis=(0, 2))


# ---------------------------------------------------------------------------
# Row-norm kernel: sum(||row||_2) and sum(||row||_2^2) for an (R, C) array.
# Used for eikonal (implicit_nablas) and latent (embedding_inst) terms, whose
# row counts may differ from the ray count.
# ---------------------------------------------------------------------------
def _rownorm_kernel(x_ref, out_ref, acc_ref):
    k = pl.program_id(1)

    @pl.when(k == 0)
    def _init():
        acc_ref[...] = jnp.zeros_like(acc_ref)

    n_ch = x_ref.shape[0]
    n_chunks = x_ref.shape[1] // CH

    def body(j, carry):
        off = pl.multiple_of(j * CH, CH)
        sq = None
        for c in range(n_ch):
            xc = x_ref[c, pl.ds(off, CH), :]
            sq = xc * xc if sq is None else sq + xc * xc
        acc_ref[0] += jnp.sqrt(sq)   # sum of row L2 norms      (zero rows add 0)
        acc_ref[1] += sq             # sum of row squared norms (zero rows add 0)
        return carry

    lax.fori_loop(0, n_chunks, body, 0)

    @pl.when(k == pl.num_programs(1) - 1)
    def _fin():
        out_ref[0] = jnp.sum(acc_ref[...], axis=1)            # (2, 128)


def _rownorm_stats(x, max_rows):
    """x: (R, C).  Returns (sum ||row||, sum ||row||^2) over the R rows."""
    r, c = x.shape
    xt = x.astype(jnp.float32).T              # (C, R): channels lead, rows lane-dense
    g = -(-r // LN)
    tr, g_pad = _tile_rows(c, g, max_rows)
    k_steps = g_pad // (NCORES * tr)
    blocks = _to_lane_blocks(xt, g_pad)

    out = pl.pallas_call(
        _rownorm_kernel,
        out_shape=jax.ShapeDtypeStruct((NCORES, 2, LN), jnp.float32),
        grid=(NCORES, k_steps),
        in_specs=[pl.BlockSpec((c, tr, LN),
                               lambda ci, k: (0, ci * k_steps + k, 0))],
        out_specs=pl.BlockSpec((1, 2, LN), lambda ci, k: (ci, 0, 0)),
        scratch_shapes=[pltpu.VMEM((2, CH, LN), jnp.float32)],
        compiler_params=pltpu.CompilerParams(
            dimension_semantics=("parallel", "arbitrary"),
            vmem_limit_bytes=_VMEM_LIMIT),
    )(blocks)
    sums = jnp.sum(out, axis=(0, 2))
    return sums[0], sums[1]


# ---------------------------------------------------------------------------
# Forward (JAX glue around the kernels).
# ---------------------------------------------------------------------------
def _safe_div(num, den):
    return jnp.where(den > 0, num / jnp.where(den > 0, den, 1.0), 0.0)


def total_loss_forward(inputs, batch, conf, epoch=1, tile_rows=None):
    """JAX/Pallas equivalent of TotalLoss(conf, instance_only=False).forward."""
    f32 = jnp.float32
    max_rows = tile_rows or _MAX_TILE_ROWS
    flat = lambda x: x.reshape(-1).astype(f32)
    rgb_t = lambda x: x.reshape(-1, 3).astype(f32).T       # (3, N)

    scalar_rows = jnp.stack([
        flat(batch['valid_mask']),
        flat(batch['instance_mask']),
        flat(batch['instance_mask_weight']),
        flat(batch['depths']),
        flat(inputs['depth_coarse']),
        flat(inputs['depth_fine']),
        flat(inputs['depth_instance_coarse']),
        flat(inputs['depth_instance_fine']),
        flat(inputs['opacity_instance_coarse']),
        flat(inputs['opacity_instance_fine']),
    ], axis=0)                                             # (10, N)
    packed = jnp.concatenate([
        scalar_rows,
        rgb_t(batch['rgbs']),
        rgb_t(inputs['rgb_coarse']),
        rgb_t(inputs['rgb_fine']),
        rgb_t(inputs['rgb_instance_coarse']),
        rgb_t(inputs['rgb_instance_fine']),
    ], axis=0)                                             # (NROWS, N)

    s = _main_stats(packed, max_rows)
    (s_v, s_cc, s_cf, s_dm, s_dc, s_df, s_oc, s_of,
     s_vim, s_icc, s_icf, s_idm, s_idc, s_idf) = [s[i] for i in range(NSTATS)]

    # TODO(synk): the PyTorch module returns None (and drops the dict key) when a
    # sub-loss mask is empty; with static shapes we instead contribute 0 via _safe_div.
    loss_dict = {}
    loss_dict['color_loss'] = conf['color_loss_weight'] * (
        _safe_div(s_cc, 3.0 * s_v) + _safe_div(s_cf, 3.0 * s_v))
    loss_dict['depth_loss'] = conf['depth_loss_weight'] * (
        _safe_div(s_dc, s_dm) + _safe_div(s_df, s_dm))
    if epoch >= 0:
        loss_dict['opacity_loss'] = conf['opacity_loss_weight'] * (
            _safe_div(s_oc, s_v) + _safe_div(s_of, s_v))
        loss_dict['instance_color_loss'] = conf['instance_color_loss_weight'] * (
            _safe_div(s_icc, 3.0 * s_vim) + _safe_div(s_icf, 3.0 * s_vim))
        loss_dict['instance_depth_loss'] = conf['instance_depth_loss_weight'] * (
            _safe_div(s_idc, s_idm) + _safe_div(s_idf, s_idm))
    if conf.get('eikonal_loss_weight', 0) > 0 and 'implicit_nablas' in inputs:
        nab = inputs['implicit_nablas'].reshape(-1, 3)
        m = nab.shape[0]
        nab_norm_sum, nab_sq_sum = _rownorm_stats(nab, max_rows)
        # sum_rows (||n|| - 1)^2 == sum ||n||^2 - 2 sum ||n|| + M  (zero pad rows are neutral)
        loss_dict['eikonal_loss'] = conf['eikonal_loss_weight'] * (
            (nab_sq_sum - 2.0 * nab_norm_sum + m) / m)
    if 'embedding_inst' in batch and conf.get('latent_loss_weight', 0) > 0:
        emb = batch['embedding_inst']
        emb_norm_sum, _ = _rownorm_stats(emb.reshape(emb.shape[0], -1), max_rows)
        loss_dict['latent_loss'] = conf['latent_loss_weight'] * (emb_norm_sum / emb.shape[0])

    loss_sum = functools.reduce(lambda a, b: a + b, loss_dict.values())
    for k in list(loss_dict):
        wk = f'{k}_weight'
        if wk in conf:
            loss_dict[k] = loss_dict[k] / conf[wk]
    return loss_sum, loss_dict


# ---------------------------------------------------------------------------
# Pure-jnp reference with the same masked-mean semantics.
# ---------------------------------------------------------------------------
def _reference_loss_sum(inputs, batch, conf, epoch=1):
    f32 = jnp.float32
    v = batch['valid_mask'].reshape(-1, 1).astype(f32)
    im = batch['instance_mask'].reshape(-1, 1).astype(f32)
    w = batch['instance_mask_weight'].reshape(-1, 1).astype(f32)
    d = batch['depths'].reshape(-1, 1).astype(f32)
    t = batch['rgbs'].reshape(-1, 3).astype(f32)
    dpos = (d > 0).astype(f32)
    dm, vim, idm = v * dpos, v * im, v * dpos * im

    sq = lambda a, b: jnp.sum((a.reshape(-1, 3) - b) ** 2, axis=-1, keepdims=True)
    color = conf['color_loss_weight'] * (
        jnp.sum(v * sq(inputs['rgb_coarse'], t)) / (3 * jnp.sum(v))
        + jnp.sum(v * sq(inputs['rgb_fine'], t)) / (3 * jnp.sum(v)))
    depth = conf['depth_loss_weight'] * (
        jnp.sum(dm * (inputs['depth_coarse'].reshape(-1, 1) - d) ** 2) / jnp.sum(dm)
        + jnp.sum(dm * (inputs['depth_fine'].reshape(-1, 1) - d) ** 2) / jnp.sum(dm))
    opac = conf['opacity_loss_weight'] * (
        jnp.sum(v * w * (jnp.clip(inputs['opacity_instance_coarse'].reshape(-1, 1), 0, 1) - im) ** 2) / jnp.sum(v)
        + jnp.sum(v * w * (jnp.clip(inputs['opacity_instance_fine'].reshape(-1, 1), 0, 1) - im) ** 2) / jnp.sum(v))
    icol = conf['instance_color_loss_weight'] * (
        jnp.sum(vim * w * sq(inputs['rgb_instance_coarse'], t)) / (3 * jnp.sum(vim))
        + jnp.sum(vim * w * sq(inputs['rgb_instance_fine'], t)) / (3 * jnp.sum(vim)))
    idep = conf['instance_depth_loss_weight'] * (
        jnp.sum(idm * w * (inputs['depth_instance_coarse'].reshape(-1, 1) - d) ** 2) / jnp.sum(idm)
        + jnp.sum(idm * w * (inputs['depth_instance_fine'].reshape(-1, 1) - d) ** 2) / jnp.sum(idm))
    nab = inputs['implicit_nablas'].reshape(-1, 3)
    eik = conf['eikonal_loss_weight'] * jnp.mean((jnp.linalg.norm(nab, axis=-1) - 1.0) ** 2)
    lat = conf['latent_loss_weight'] * jnp.mean(jnp.linalg.norm(batch['embedding_inst'], axis=1))
    return color + depth + opac + icol + idep + eik + lat


if __name__ == "__main__":
    N = 3000          # rays (deliberately NOT a multiple of 128 -> exercises padding)
    M = 5000          # nabla rows (different from N -> exercises the separate row-norm call)
    D = 16            # instance embedding dim
    key = jax.random.PRNGKey(0)
    ks = list(jax.random.split(key, 20))

    conf = dict(
        color_loss_weight=1.0,
        depth_loss_weight=0.1,
        opacity_loss_weight=10.0,
        instance_color_loss_weight=1.0,
        instance_depth_loss_weight=1.0,
        eikonal_loss_weight=0.1,
        latent_loss_weight=0.01,
    )

    batch = {
        'rgbs': jax.random.uniform(ks[0], (N, 3), jnp.float32),
        'valid_mask': jax.random.uniform(ks[1], (N,)) > 0.2,
        'instance_mask': jax.random.uniform(ks[2], (N,)) > 0.5,
        'instance_mask_weight': jax.random.uniform(ks[3], (N,), jnp.float32, 0.5, 2.0),
        'depths': jnp.where(jax.random.uniform(ks[4], (N,)) > 0.1,
                            jax.random.uniform(ks[5], (N,), jnp.float32, 0.1, 4.0), 0.0),
        'embedding_inst': jax.random.normal(ks[6], (N, D), jnp.float32),
    }
    inputs = {
        'rgb_coarse': jax.random.uniform(ks[7], (N, 3), jnp.float32),
        'rgb_fine': jax.random.uniform(ks[8], (N, 3), jnp.float32),
        'rgb_instance_coarse': jax.random.uniform(ks[9], (N, 3), jnp.float32),
        'rgb_instance_fine': jax.random.uniform(ks[10], (N, 3), jnp.float32),
        'depth_coarse': jax.random.uniform(ks[11], (N,), jnp.float32, 0.0, 4.0),
        'depth_fine': jax.random.uniform(ks[12], (N,), jnp.float32, 0.0, 4.0),
        'depth_instance_coarse': jax.random.uniform(ks[13], (N,), jnp.float32, 0.0, 4.0),
        'depth_instance_fine': jax.random.uniform(ks[14], (N,), jnp.float32, 0.0, 4.0),
        'opacity_instance_coarse': jax.random.uniform(ks[15], (N,), jnp.float32, -0.2, 1.2),
        'opacity_instance_fine': jax.random.uniform(ks[16], (N,), jnp.float32, -0.2, 1.2),
        'implicit_nablas': jax.random.normal(ks[17], (M, 3), jnp.float32),
    }

    ref = jax.block_until_ready(_reference_loss_sum(inputs, batch, conf, epoch=1))

    # Run with default (large) tiles and with tiny tiles that force a multi-step
    # reduction grid (exercises the resident-scratch accumulate path).
    for tr in (None, CH):
        loss_sum, loss_dict = total_loss_forward(inputs, batch, conf, epoch=1, tile_rows=tr)
        loss_sum = jax.block_until_ready(loss_sum)
        jax.block_until_ready(loss_dict)
        assert jnp.isfinite(loss_sum), "non-finite loss"
        assert jnp.allclose(loss_sum, ref, rtol=1e-4, atol=1e-5), (tr, loss_sum, ref)

    print("KERNEL_OK")
</pallas_src>

<mosaic_0001>
module attributes {stable_mosaic.version = 11 : i64} {
  func.func @_main_stats_kernel(%arg0: i32, %arg1: i32, %arg2: memref<25x16x128xf32, #tpu.memory_space<vmem>>, %arg3: memref<1x14x128xf32, #tpu.memory_space<vmem>>, %arg4: memref<14x8x128xf32, #tpu.memory_space<vmem>>) attributes {dimension_semantics = [#tpu.dimension_semantics<parallel>, #tpu.dimension_semantics<arbitrary>], iteration_bounds = array<i64: 2, 1>, scalar_prefetch = 0 : i64, scratch_operands = 1 : i64, tpu.core_type = #tpu.core_type<tc>, window_params = [{transform_indices = @transform_0, window_bounds = array<i64: 25, 16, 128>}, {transform_indices = @transform_1, window_bounds = array<i64: 1, 14, 128>}]} {
    %c0_i32 = arith.constant 0 : i32
    %0 = arith.cmpi eq, %arg1, %c0_i32 : i32
    %1 = arith.extui %0 : i1 to i32
    %c0_i32_0 = arith.constant 0 : i32
    %2 = arith.cmpi ne, %1, %c0_i32_0 : i32
    scf.if %2 {
      %cst = arith.constant 0.000000e+00 : f32
      %7 = vector.broadcast %cst : f32 to vector<14x8x128xf32>
      %c0 = arith.constant 0 : index
      %c0_5 = arith.constant 0 : index
      %c0_6 = arith.constant 0 : index
      %8 = vector.load %arg4[%c0, %c0_5, %c0_6] : memref<14x8x128xf32, #tpu.memory_space<vmem>>, vector<14x8x128xf32>
      tpu.vector_store %arg4[%c0, %c0_5, %c0_6], %7 {strides = array<i32>} : memref<14x8x128xf32, #tpu.memory_space<vmem>>, vector<14x8x128xf32>,
    } else {
    }
    %c0_i32_1 = arith.constant 0 : i32
    %c2_i32 = arith.constant 2 : i32
    %3 = arith.addi %c0_i32_1, %c2_i32 : i32
    %c1_i32 = arith.constant 1 : i32
    scf.for %arg5 = %c0_i32_1 to %3 step %c1_i32  : i32 {
      %c8_i32 = arith.constant 8 : i32
      %7 = arith.muli %arg5, %c8_i32 : i32
      %8 = tpu.assume_multiple %7, 8 : i32
      %c0 = arith.constant 0 : index
      %9 = arith.index_cast %8 : i32 to index
      %c0_5 = arith.constant 0 : index
      %10 = vector.load %arg2[%c0, %9, %c0_5] : memref<25x16x128xf32, #tpu.memory_space<vmem>>, vector<1x8x128xf32>
      %11 = vector.shape_cast %10 : vector<1x8x128xf32> to vector<8x128xf32>
      %c1 = arith.constant 1 : index
      %12 = arith.index_cast %8 : i32 to index
      %c0_6 = arith.constant 0 : index
      %13 = vector.load %arg2[%c1, %12, %c0_6] : memref<25x16x128xf32, #tpu.memory_space<vmem>>, vector<1x8x128xf32>
      %14 = vector.shape_cast %13 : vector<1x8x128xf32> to vector<8x128xf32>
      %c2 = arith.constant 2 : index
      %15 = arith.index_cast %8 : i32 to index
      %c0_7 = arith.constant 0 : index
      %16 = vector.load %arg2[%c2, %15, %c0_7] : memref<25x16x128xf32, #tpu.memory_space<vmem>>, vector<1x8x128xf32>
      %17 = vector.shape_cast %16 : vector<1x8x128xf32> to vector<8x128xf32>
      %c3 = arith.constant 3 : index
      %18 = arith.index_cast %8 : i32 to index
      %c0_8 = arith.constant 0 : index
      %19 = vector.load %arg2[%c3, %18, %c0_8] : memref<25x16x128xf32, #tpu.memory_space<vmem>>, vector<1x8x128xf32>
      %20 = vector.shape_cast %19 : vector<1x8x128xf32> to vector<8x128xf32>
      %cst = arith.constant 0.000000e+00 : f32
      %21 = vector.broadcast %cst : f32 to vector<8x128xf32>
      %22 = arith.cmpf ogt, %20, %21 : vector<8x128xf32>
      %23 = arith.extui %22 : vector<8x128xi1> to vector<8x128xi32>
      %24 = arith.sitofp %23 : vector<8x128xi32> to vector<8x128xf32>
      %25 = arith.mulf %11, %24 : vector<8x128xf32>
      %26 = arith.mulf %11, %14 : vector<8x128xf32>
      %27 = arith.mulf %25, %14 : vector<8x128xf32>
      %28 = arith.mulf %11, %17 : vector<8x128xf32>
      %29 = arith.mulf %26, %17 : vector<8x128xf32>
      %30 = arith.mulf %27, %17 : vector<8x128xf32>
      %c10 = arith.constant 10 : index
      %31 = arith.index_cast %8 : i32 to index
      %c0_9 = arith.constant 0 : index
      %32 = vector.load %arg2[%c10, %31, %c0_9] : memref<25x16x128xf32, #tpu.memory_space<vmem>>, vector<1x8x128xf32>
      %33 = vector.shape_cast %32 : vector<1x8x128xf32> to vector<8x128xf32>
      %c11 = arith.constant 11 : index
      %34 = arith.index_cast %8 : i32 to index
      %c0_10 = arith.constant 0 : index
      %35 = vector.load %arg2[%c11, %34, %c0_10] : memref<25x16x128xf32, #tpu.memory_space<vmem>>, vector<1x8x128xf32>
      %36 = vector.shape_cast %35 : vector<1x8x128xf32> to vector<8x128xf32>
      %c12 = arith.constant 12 : index
      %37 = arith.index_cast %8 : i32 to index
      %c0_11 = arith.constant 0 : index
      %38 = vector.load %arg2[%c12, %37, %c0_11] : memref<25x16x128xf32, #tpu.memory_space<vmem>>, vector<1x8x128xf32>
      %39 = vector.shape_cast %38 : vector<1x8x128xf32> to vector<8x128xf32>
      %c13 = arith.constant 13 : index
      %40 = arith.index_cast %8 : i32 to index
      %c0_12 = arith.constant 0 : index
      %41 = vector.load %arg2[%c13, %40, %c0_12] : memref<25x16x128xf32, #tpu.memory_space<vmem>>, vector<1x8x128xf32>
      %42 = vector.shape_cast %41 : vector<1x8x128xf32> to vector<8x128xf32>
      %43 = arith.subf %42, %33 : vector<8x128xf32>
      %44 = arith.mulf %43, %43 : vector<8x128xf32>
      %c14 = arith.constant 14 : index
      %45 = arith.index_cast %8 : i32 to index
      %c0_13 = arith.constant 0 : index
      %46 = vector.load %arg2[%c14, %45, %c0_13] : memref<25x16x128xf32, #tpu.memory_space<vmem>>, vector<1x8x128xf32>
      %47 = vector.shape_cast %46 : vector<1x8x128xf32> to vector<8x128xf32>
      %48 = arith.subf %47, %36 : vector<8x128xf32>
      %49 = arith.mulf %48, %48 : vector<8x128xf32>
      %50 = arith.addf %44, %49 : vector<8x128xf32>
      %c15 = arith.constant 15 : index
      %51 = arith.index_cast %8 : i32 to index
      %c0_14 = arith.constant 0 : index
      %52 = vector.load %arg2[%c15, %51, %c0_14] : memref<25x16x128xf32, #tpu.memory_space<vmem>>, vector<1x8x128xf32>
      %53 = vector.shape_cast %52 : vector<1x8x128xf32> to vector<8x128xf32>
      %54 = arith.subf %53, %39 : vector<8x128xf32>
      %55 = arith.mulf %54, %54 : vector<8x128xf32>
      %56 = arith.addf %50, %55 : vector<8x128xf32>
      %c16 = arith.constant 16 : index
      %57 = arith.index_cast %8 : i32 to index
      %c0_15 = arith.constant 0 : index
      %58 = vector.load %arg2[%c16, %57, %c0_15] : memref<25x16x128xf32, #tpu.memory_space<vmem>>, vector<1x8x128xf32>
      %59 = vector.shape_cast %58 : vector<1x8x128xf32> to vector<8x128xf32>
      %60 = arith.subf %59, %33 : vector<8x128xf32>
      %61 = arith.mulf %60, %60 : vector<8x128xf32>
      %c17 = arith.constant 17 : index
      %62 = arith.index_cast %8 : i32 to index
      %c0_16 = arith.constant 0 : index
      %63 = vector.load %arg2[%c17, %62, %c0_16] : memref<25x16x128xf32, #tpu.memory_space<vmem>>, vector<1x8x128xf32>
      %64 = vector.shape_cast %63 : vector<1x8x128xf32> to vector<8x128xf32>
      %65 = arith.subf %64, %36 : vector<8x128xf32>
      %66 = arith.mulf %65, %65 : vector<8x128xf32>
      %67 = arith.addf %61, %66 : vector<8x128xf32>
      %c18 = arith.constant 18 : index
      %68 = arith.index_cast %8 : i32 to index
      %c0_17 = arith.constant 0 : index
      %69 = vector.load %arg2[%c18, %68, %c0_17] : memref<25x16x128xf32, #tpu.memory_space<vmem>>, vector<1x8x128xf32>
      %70 = vector.shape_cast %69 : vector<1x8x128xf32> to vector<8x128xf32>
      %71 = arith.subf %70, %39 : vector<8x128xf32>
      %72 = arith.mulf %71, %71 : vector<8x128xf32>
      %73 = arith.addf %67, %72 : vector<8x128xf32>
      %c19 = arith.constant 19 : index
      %74 = arith.index_cast %8 : i32 to index
      %c0_18 = arith.constant 0 : index
      %75 = vector.load %arg2[%c19, %74, %c0_18] : memref<25x16x128xf32, #tpu.memory_space<vmem>>, vector<1x8x128xf32>
      %76 = vector.shape_cast %75 : vector<1x8x128xf32> to vector<8x128xf32>
      %77 = arith.subf %76, %33 : vector<8x128xf32>
      %78 = arith.mulf %77, %77 : vector<8x128xf32>
      %c20 = arith.constant 20 : index
      %79 = arith.index_cast %8 : i32 to index
      %c0_19 = arith.constant 0 : index
      %80 = vector.load %arg2[%c20, %79, %c0_19] : memref<25x16x128xf32, #tpu.memory_space<vmem>>, vector<1x8x128xf32>
      %81 = vector.shape_cast %80 : vector<1x8x128xf32> to vector<8x128xf32>
      %82 = arith.subf %81, %36 : vector<8x128xf32>
      %83 = arith.mulf %82, %82 : vector<8x128xf32>
      %84 = arith.addf %78, %83 : vector<8x128xf32>
      %c21 = arith.constant 21 : index
      %85 = arith.index_cast %8 : i32 to index
      %c0_20 = arith.constant 0 : index
      %86 = vector.load %arg2[%c21, %85, %c0_20] : memref<25x16x128xf32, #tpu.memory_space<vmem>>, vector<1x8x128xf32>
      %87 = vector.shape_cast %86 : vector<1x8x128xf32> to vector<8x128xf32>
      %88 = arith.subf %87, %39 : vector<8x128xf32>
      %89 = arith.mulf %88, %88 : vector<8x128xf32>
      %90 = arith.addf %84, %89 : vector<8x128xf32>
      %c22 = arith.constant 22 : index
      %91 = arith.index_cast %8 : i32 to index
      %c0_21 = arith.constant 0 : index
      %92 = vector.load %arg2[%c22, %91, %c0_21] : memref<25x16x128xf32, #tpu.memory_space<vmem>>, vector<1x8x128xf32>
      %93 = vector.shape_cast %92 : vector<1x8x128xf32> to vector<8x128xf32>
      %94 = arith.subf %93, %33 : vector<8x128xf32>
      %95 = arith.mulf %94, %94 : vector<8x128xf32>
      %c23 = arith.constant 23 : index
      %96 = arith.index_cast %8 : i32 to index
      %c0_22 = arith.constant 0 : index
      %97 = vector.load %arg2[%c23, %96, %c0_22] : memref<25x16x128xf32, #tpu.memory_space<vmem>>, vector<1x8x128xf32>
      %98 = vector.shape_cast %97 : vector<1x8x128xf32> to vector<8x128xf32>
      %99 = arith.subf %98, %36 : vector<8x128xf32>
      %100 = arith.mulf %99, %99 : vector<8x128xf32>
      %101 = arith.addf %95, %100 : vector<8x128xf32>
      %c24 = arith.constant 24 : index
      %102 = arith.index_cast %8 : i32 to index
      %c0_23 = arith.constant 0 : index
      %103 = vector.load %arg2[%c24, %102, %c0_23] : memref<25x16x128xf32, #tpu.memory_space<vmem>>, vector<1x8x128xf32>
      %104 = vector.shape_cast %103 : vector<1x8x128xf32> to vector<8x128xf32>
      %105 = arith.subf %104, %39 : vector<8x128xf32>
      %106 = arith.mulf %105, %105 : vector<8x128xf32>
      %107 = arith.addf %101, %106 : vector<8x128xf32>
      %c4 = arith.constant 4 : index
      %108 = arith.index_cast %8 : i32 to index
      %c0_24 = arith.constant 0 : index
      %109 = vector.load %arg2[%c4, %108, %c0_24] : memref<25x16x128xf32, #tpu.memory_space<vmem>>, vector<1x8x128xf32>
      %110 = vector.shape_cast %109 : vector<1x8x128xf32> to vector<8x128xf32>
      %111 = arith.subf %110, %20 : vector<8x128xf32>
      %c5 = arith.constant 5 : index
      %112 = arith.index_cast %8 : i32 to index
      %c0_25 = arith.constant 0 : index
      %113 = vector.load %arg2[%c5, %112, %c0_25] : memref<25x16x128xf32, #tpu.memory_space<vmem>>, vector<1x8x128xf32>
      %114 = vector.shape_cast %113 : vector<1x8x128xf32> to vector<8x128xf32>
      %115 = arith.subf %114, %20 : vector<8x128xf32>
      %c6 = arith.constant 6 : index
      %116 = arith.index_cast %8 : i32 to index
      %c0_26 = arith.constant 0 : index
      %117 = vector.load %arg2[%c6, %116, %c0_26] : memref<25x16x128xf32, #tpu.memory_space<vmem>>, vector<1x8x128xf32>
      %118 = vector.shape_cast %117 : vector<1x8x128xf32> to vector<8x128xf32>
      %119 = arith.subf %118, %20 : vector<8x128xf32>
      %c7 = arith.constant 7 : index
      %120 = arith.index_cast %8 : i32 to index
      %c0_27 = arith.constant 0 : index
      %121 = vector.load %arg2[%c7, %120, %c0_27] : memref<25x16x128xf32, #tpu.memory_space<vmem>>, vector<1x8x128xf32>
      %122 = vector.shape_cast %121 : vector<1x8x128xf32> to vector<8x128xf32>
      %123 = arith.subf %122, %20 : vector<8x128xf32>
      %c8 = arith.constant 8 : index
      %124 = arith.index_cast %8 : i32 to index
      %c0_28 = arith.constant 0 : index
      %125 = vector.load %arg2[%c8, %124, %c0_28] : memref<25x16x128xf32, #tpu.memory_space<vmem>>, vector<1x8x128xf32>
      %126 = vector.shape_cast %125 : vector<1x8x128xf32> to vector<8x128xf32>
      %cst_29 = arith.constant 0.000000e+00 : f32
      %cst_30 = arith.constant 1.000000e+00 : f32
      %127 = vector.broadcast %cst_29 : f32 to vector<8x128xf32>
      %128 = arith.maximumf %127, %126 : vector<8x128xf32>
      %129 = vector.broadcast %cst_30 : f32 to vector<8x128xf32>
      %130 = arith.minimumf %129, %128 : vector<8x128xf32>
      %131 = arith.subf %130, %14 : vector<8x128xf32>
      %c9 = arith.constant 9 : index
      %132 = arith.index_cast %8 : i32 to index
      %c0_31 = arith.constant 0 : index
      %133 = vector.load %arg2[%c9, %132, %c0_31] : memref<25x16x128xf32, #tpu.memory_space<vmem>>, vector<1x8x128xf32>
      %134 = vector.shape_cast %133 : vector<1x8x128xf32> to vector<8x128xf32>
      %cst_32 = arith.constant 0.000000e+00 : f32
      %cst_33 = arith.constant 1.000000e+00 : f32
      %135 = vector.broadcast %cst_32 : f32 to vector<8x128xf32>
      %136 = arith.maximumf %135, %134 : vector<8x128xf32>
      %137 = vector.broadcast %cst_33 : f32 to vector<8x128xf32>
      %138 = arith.minimumf %137, %136 : vector<8x128xf32>
      %139 = arith.subf %138, %14 : vector<8x128xf32>
      %140 = arith.mulf %11, %56 : vector<8x128xf32>
      %141 = arith.mulf %11, %73 : vector<8x128xf32>
      %142 = arith.mulf %25, %111 : vector<8x128xf32>
      %143 = arith.mulf %142, %111 : vector<8x128xf32>
      %144 = arith.mulf %25, %115 : vector<8x128xf32>
      %145 = arith.mulf %144, %115 : vector<8x128xf32>
      %146 = arith.mulf %28, %131 : vector<8x128xf32>
      %147 = arith.mulf %146, %131 : vector<8x128xf32>
      %148 = arith.mulf %28, %139 : vector<8x128xf32>
      %149 = arith.mulf %148, %139 : vector<8x128xf32>
      %150 = arith.mulf %29, %90 : vector<8x128xf32>
      %151 = arith.mulf %29, %107 : vector<8x128xf32>
      %152 = arith.mulf %30, %119 : vector<8x128xf32>
      %153 = arith.mulf %152, %119 : vector<8x128xf32>
      %154 = arith.mulf %30, %123 : vector<8x128xf32>
      %155 = arith.mulf %154, %123 : vector<8x128xf32>
      %c0_34 = arith.constant 0 : index
      %c0_35 = arith.constant 0 : index
      %c0_36 = arith.constant 0 : index
      %156 = vector.load %arg4[%c0_34, %c0_35, %c0_36] : memref<14x8x128xf32, #tpu.memory_space<vmem>>, vector<1x8x128xf32>
      %157 = vector.shape_cast %156 : vector<1x8x128xf32> to vector<8x128xf32>
      %158 = arith.addf %157, %11 : vector<8x128xf32>
      %c0_37 = arith.constant 0 : index
      %c0_38 = arith.constant 0 : index
      %c0_39 = arith.constant 0 : index
      %159 = vector.load %arg4[%c0_37, %c0_38, %c0_39] : memref<14x8x128xf32, #tpu.memory_space<vmem>>, vector<1x8x128xf32>
      %160 = vector.shape_cast %159 : vector<1x8x128xf32> to vector<8x128xf32>
      %161 = vector.shape_cast %158 : vector<8x128xf32> to vector<1x8x128xf32>
      tpu.vector_store %arg4[%c0_37, %c0_38, %c0_39], %161 {strides = array<i32>} : memref<14x8x128xf32, #tpu.memory_space<vmem>>, vector<1x8x128xf32>,
      %c1_40 = arith.constant 1 : index
      %c0_41 = arith.constant 0 : index
      %c0_42 = arith.constant 0 : index
      %162 = vector.load %arg4[%c1_40, %c0_41, %c0_42] : memref<14x8x128xf32, #tpu.memory_space<vmem>>, vector<1x8x128xf32>
      %163 = vector.shape_cast %162 : vector<1x8x128xf32> to vector<8x128xf32>
      %164 = arith.addf %163, %140 : vector<8x128xf32>
      %c1_43 = arith.constant 1 : index
      %c0_44 = arith.constant 0 : index
      %c0_45 = arith.constant 0 : index
      %165 = vector.load %arg4[%c1_43, %c0_44, %c0_45] : memref<14x8x128xf32, #tpu.memory_space<vmem>>, vector<1x8x128xf32>
      %166 = vector.shape_cast %165 : vector<1x8x128xf32> to vector<8x128xf32>
      %167 = vector.shape_cast %164 : vector<8x128xf32> to vector<1x8x128xf32>
      tpu.vector_store %arg4[%c1_43, %c0_44, %c0_45], %167 {strides = array<i32>} : memref<14x8x128xf32, #tpu.memory_space<vmem>>, vector<1x8x128xf32>,
      %c2_46 = arith.constant 2 : index
      %c0_47 = arith.constant 0 : index
      %c0_48 = arith.constant 0 : index
      %168 = vector.load %arg4[%c2_46, %c0_47, %c0_48] : memref<14x8x128xf32, #tpu.memory_space<vmem>>, vector<1x8x128xf32>
      %169 = vector.shape_cast %168 : vector<1x8x128xf32> to vector<8x128xf32>
      %170 = arith.addf %169, %141 : vector<8x128xf32>
      %c2_49 = arith.constant 2 : index
      %c0_50 = arith.constant 0 : index
      %c0_51 = arith.constant 0 : index
      %171 = vector.load %arg4[%c2_49, %c0_50, %c0_51] : memref<14x8x128xf32, #tpu.memory_space<vmem>>, vector<1x8x128xf32>
      %172 = vector.shape_cast %171 : vector<1x8x128xf32> to vector<8x128xf32>
      %173 = vector.shape_cast %170 : vector<8x128xf32> to vector<1x8x128xf32>
      tpu.vector_store %arg4[%c2_49, %c0_50, %c0_51], %173 {strides = array<i32>} : memref<14x8x128xf32, #tpu.memory_space<vmem>>, vector<1x8x128xf32>,
      %c3_52 = arith.constant 3 : index
      %c0_53 = arith.constant 0 : index
      %c0_54 = arith.constant 0 : index
      %174 = vector.load %arg4[%c3_52, %c0_53, %c0_54] : memref<14x8x128xf32, #tpu.memory_space<vmem>>, vector<1x8x128xf32>
      %175 = vector.shape_cast %174 : vector<1x8x128xf32> to vector<8x128xf32>
      %176 = arith.addf %175, %25 : vector<8x128xf32>
      %c3_55 = arith.constant 3 : index
      %c0_56 = arith.constant 0 : index
      %c0_57 = arith.constant 0 : index
      %177 = vector.load %arg4[%c3_55, %c0_56, %c0_57] : memref<14x8x128xf32, #tpu.memory_space<vmem>>, vector<1x8x128xf32>
      %178 = vector.shape_cast %177 : vector<1x8x128xf32> to vector<8x128xf32>
      %179 = vector.shape_cast %176 : vector<8x128xf32> to vector<1x8x128xf32>
      tpu.vector_store %arg4[%c3_55, %c0_56, %c0_57], %179 {strides = array<i32>} : memref<14x8x128xf32, #tpu.memory_space<vmem>>, vector<1x8x128xf32>,
      %c4_58 = arith.constant 4 : index
      %c0_59 = arith.constant 0 : index
      %c0_60 = arith.constant 0 : index
      %180 = vector.load %arg4[%c4_58, %c0_59, %c0_60] : memref<14x8x128xf32, #tpu.memory_space<vmem>>, vector<1x8x128xf32>
      %181 = vector.shape_cast %180 : vector<1x8x128xf32> to vector<8x128xf32>
      %182 = arith.addf %181, %143 : vector<8x128xf32>
      %c4_61 = arith.constant 4 : index
      %c0_62 = arith.constant 0 : index
      %c0_63 = arith.constant 0 : index
      %183 = vector.load %arg4[%c4_61, %c0_62, %c0_63] : memref<14x8x128xf32, #tpu.memory_space<vmem>>, vector<1x8x128xf32>
      %184 = vector.shape_cast %183 : vector<1x8x128xf32> to vector<8x128xf32>
      %185 = vector.shape_cast %182 : vector<8x128xf32> to vector<1x8x128xf32>
      tpu.vector_store %arg4[%c4_61, %c0_62, %c0_63], %185 {strides = array<i32>} : memref<14x8x128xf32, #tpu.memory_space<vmem>>, vector<1x8x128xf32>,
      %c5_64 = arith.constant 5 : index
      %c0_65 = arith.constant 0 : index
      %c0_66 = arith.constant 0 : index
      %186 = vector.load %arg4[%c5_64, %c0_65, %c0_66] : memref<14x8x128xf32, #tpu.memory_space<vmem>>, vector<1x8x128xf32>
      %187 = vector.shape_cast %186 : vector<1x8x128xf32> to vector<8x128xf32>
      %188 = arith.addf %187, %145 : vector<8x128xf32>
      %c5_67 = arith.constant 5 : index
      %c0_68 = arith.constant 0 : index
      %c0_69 = arith.constant 0 : index
      %189 = vector.load %arg4[%c5_67, %c0_68, %c0_69] : memref<14x8x128xf32, #tpu.memory_space<vmem>>, vector<1x8x128xf32>
      %190 = vector.shape_cast %189 : vector<1x8x128xf32> to vector<8x128xf32>
      %191 = vector.shape_cast %188 : vector<8x128xf32> to vector<1x8x128xf32>
      tpu.vector_store %arg4[%c5_67, %c0_68, %c0_69], %191 {strides = array<i32>} : memref<14x8x128xf32, #tpu.memory_space<vmem>>, vector<1x8x128xf32>,
      %c6_70 = arith.constant 6 : index
      %c0_71 = arith.constant 0 : index
      %c0_72 = arith.constant 0 : index
      %192 = vector.load %arg4[%c6_70, %c0_71, %c0_72] : memref<14x8x128xf32, #tpu.memory_space<vmem>>, vector<1x8x128xf32>
      %193 = vector.shape_cast %192 : vector<1x8x128xf32> to vector<8x128xf32>
      %194 = arith.addf %193, %147 : vector<8x128xf32>
      %c6_73 = arith.constant 6 : index
      %c0_74 = arith.constant 0 : index
      %c0_75 = arith.constant 0 : index
      %195 = vector.load %arg4[%c6_73, %c0_74, %c0_75] : memref<14x8x128xf32, #tpu.memory_space<vmem>>, vector<1x8x128xf32>
      %196 = vector.shape_cast %195 : vector<1x8x128xf32> to vector<8x128xf32>
      %197 = vector.shape_cast %194 : vector<8x128xf32> to vector<1x8x128xf32>
      tpu.vector_store %arg4[%c6_73, %c0_74, %c0_75], %197 {strides = array<i32>} : memref<14x8x128xf32, #tpu.memory_space<vmem>>, vector<1x8x128xf32>,
      %c7_76 = arith.constant 7 : index
      %c0_77 = arith.constant 0 : index
      %c0_78 = arith.constant 0 : index
      %198 = vector.load %arg4[%c7_76, %c0_77, %c0_78] : memref<14x8x128xf32, #tpu.memory_space<vmem>>, vector<1x8x128xf32>
      %199 = vector.shape_cast %198 : vector<1x8x128xf32> to vector<8x128xf32>
      %200 = arith.addf %199, %149 : vector<8x128xf32>
      %c7_79 = arith.constant 7 : index
      %c0_80 = arith.constant 0 : index
      %c0_81 = arith.constant 0 : index
      %201 = vector.load %arg4[%c7_79, %c0_80, %c0_81] : memref<14x8x128xf32, #tpu.memory_space<vmem>>, vector<1x8x128xf32>
      %202 = vector.shape_cast %201 : vector<1x8x128xf32> to vector<8x128xf32>
      %203 = vector.shape_cast %200 : vector<8x128xf32> to vector<1x8x128xf32>
      tpu.vector_store %arg4[%c7_79, %c0_80, %c0_81], %203 {strides = array<i32>} : memref<14x8x128xf32, #tpu.memory_space<vmem>>, vector<1x8x128xf32>,
      %c8_82 = arith.constant 8 : index
      %c0_83 = arith.constant 0 : index
      %c0_84 = arith.constant 0 : index
      %204 = vector.load %arg4[%c8_82, %c0_83, %c0_84] : memref<14x8x128xf32, #tpu.memory_space<vmem>>, vector<1x8x128xf32>
      %205 = vector.shape_cast %204 : vector<1x8x128xf32> to vector<8x128xf32>
      %206 = arith.addf %205, %26 : vector<8x128xf32>
      %c8_85 = arith.constant 8 : index
      %c0_86 = arith.constant 0 : index
      %c0_87 = arith.constant 0 : index
      %207 = vector.load %arg4[%c8_85, %c0_86, %c0_87] : memref<14x8x128xf32, #tpu.memory_space<vmem>>, vector<1x8x128xf32>
      %208 = vector.shape_cast %207 : vector<1x8x128xf32> to vector<8x128xf32>
      %209 = vector.shape_cast %206 : vector<8x128xf32> to vector<1x8x128xf32>
      tpu.vector_store %arg4[%c8_85, %c0_86, %c0_87], %209 {strides = array<i32>} : memref<14x8x128xf32, #tpu.memory_space<vmem>>, vector<1x8x128xf32>,
      %c9_88 = arith.constant 9 : index
      %c0_89 = arith.constant 0 : index
      %c0_90 = arith.constant 0 : index
      %210 = vector.load %arg4[%c9_88, %c0_89, %c0_90] : memref<14x8x128xf32, #tpu.memory_space<vmem>>, vector<1x8x128xf32>
      %211 = vector.shape_cast %210 : vector<1x8x128xf32> to vector<8x128xf32>
      %212 = arith.addf %211, %150 : vector<8x128xf32>
      %c9_91 = arith.constant 9 : index
      %c0_92 = arith.constant 0 : index
      %c0_93 = arith.constant 0 : index
      %213 = vector.load %arg4[%c9_91, %c0_92, %c0_93] : memref<14x8x128xf32, #tpu.memory_space<vmem>>, vector<1x8x128xf32>
      %214 = vector.shape_cast %213 : vector<1x8x128xf32> to vector<8x128xf32>
      %215 = vector.shape_cast %212 : vector<8x128xf32> to vector<1x8x128xf32>
      tpu.vector_store %arg4[%c9_91, %c0_92, %c0_93], %215 {strides = array<i32>} : memref<14x8x128xf32, #tpu.memory_space<vmem>>, vector<1x8x128xf32>,
      %c10_94 = arith.constant 10 : index
      %c0_95 = arith.constant 0 : index
      %c0_96 = arith.constant 0 : index
      %216 = vector.load %arg4[%c10_94, %c0_95, %c0_96] : memref<14x8x128xf32, #tpu.memory_space<vmem>>, vector<1x8x128xf32>
      %217 = vector.shape_cast %216 : vector<1x8x128xf32> to vector<8x128xf32>
      %218 = arith.addf %217, %151 : vector<8x128xf32>
      %c10_97 = arith.constant 10 : index
      %c0_98 = arith.constant 0 : index
      %c0_99 = arith.constant 0 : index
      %219 = vector.load %arg4[%c10_97, %c0_98, %c0_99] : memref<14x8x128xf32, #tpu.memory_space<vmem>>, vector<1x8x128xf32>
      %220 = vector.shape_cast %219 : vector<1x8x128xf32> to vector<8x128xf32>
      %221 = vector.shape_cast %218 : vector<8x128xf32> to vector<1x8x128xf32>
      tpu.vector_store %arg4[%c10_97, %c0_98, %c0_99], %221 {strides = array<i32>} : memref<14x8x128xf32, #tpu.memory_space<vmem>>, vector<1x8x128xf32>,
      %c11_100 = arith.constant 11 : index
      %c0_101 = arith.constant 0 : index
      %c0_102 = arith.constant 0 : index
      %222 = vector.load %arg4[%c11_100, %c0_101, %c0_102] : memref<14x8x128xf32, #tpu.memory_space<vmem>>, vector<1x8x128xf32>
      %223 = vector.shape_cast %222 : vector<1x8x128xf32> to vector<8x128xf32>
      %224 = arith.addf %223, %27 : vector<8x128xf32>
      %c11_103 = arith.constant 11 : index
      %c0_104 = arith.constant 0 : index
      %c0_105 = arith.constant 0 : index
      %225 = vector.load %arg4[%c11_103, %c0_104, %c0_105] : memref<14x8x128xf32, #tpu.memory_space<vmem>>, vector<1x8x128xf32>
      %226 = vector.shape_cast %225 : vector<1x8x128xf32> to vector<8x128xf32>
      %227 = vector.shape_cast %224 : vector<8x128xf32> to vector<1x8x128xf32>
      tpu.vector_store %arg4[%c11_103, %c0_104, %c0_105], %227 {strides = array<i32>} : memref<14x8x128xf32, #tpu.memory_space<vmem>>, vector<1x8x128xf32>,
      %c12_106 = arith.constant 12 : index
      %c0_107 = arith.constant 0 : index
      %c0_108 = arith.constant 0 : index
      %228 = vector.load %arg4[%c12_106, %c0_107, %c0_108] : memref<14x8x128xf32, #tpu.memory_space<vmem>>, vector<1x8x128xf32>
      %229 = vector.shape_cast %228 : vector<1x8x128xf32> to vector<8x128xf32>
      %230 = arith.addf %229, %153 : vector<8x128xf32>
      %c12_109 = arith.constant 12 : index
      %c0_110 = arith.constant 0 : index
      %c0_111 = arith.constant 0 : index
      %231 = vector.load %arg4[%c12_109, %c0_110, %c0_111] : memref<14x8x128xf32, #tpu.memory_space<vmem>>, vector<1x8x128xf32>
      %232 = vector.shape_cast %231 : vector<1x8x128xf32> to vector<8x128xf32>
      %233 = vector.shape_cast %230 : vector<8x128xf32> to vector<1x8x128xf32>
      tpu.vector_store %arg4[%c12_109, %c0_110, %c0_111], %233 {strides = array<i32>} : memref<14x8x128xf32, #tpu.memory_space<vmem>>, vector<1x8x128xf32>,
      %c13_112 = arith.constant 13 : index
      %c0_113 = arith.constant 0 : index
      %c0_114 = arith.constant 0 : index
      %234 = vector.load %arg4[%c13_112, %c0_113, %c0_114] : memref<14x8x128xf32, #tpu.memory_space<vmem>>, vector<1x8x128xf32>
      %235 = vector.shape_cast %234 : vector<1x8x128xf32> to vector<8x128xf32>
      %236 = arith.addf %235, %155 : vector<8x128xf32>
      %c13_115 = arith.constant 13 : index
      %c0_116 = arith.constant 0 : index
      %c0_117 = arith.constant 0 : index
      %237 = vector.load %arg4[%c13_115, %c0_116, %c0_117] : memref<14x8x128xf32, #tpu.memory_space<vmem>>, vector<1x8x128xf32>
      %238 = vector.shape_cast %237 : vector<1x8x128xf32> to vector<8x128xf32>
      %239 = vector.shape_cast %236 : vector<8x128xf32> to vector<1x8x128xf32>
      tpu.vector_store %arg4[%c13_115, %c0_116, %c0_117], %239 {strides = array<i32>} : memref<14x8x128xf32, #tpu.memory_space<vmem>>, vector<1x8x128xf32>,
    }
    %c2_i32_2 = arith.constant 2 : i32
    %c0_i32_3 = arith.constant 0 : i32
    %4 = arith.cmpi eq, %arg1, %c0_i32_3 : i32
    %5 = arith.extui %4 : i1 to i32
    %c0_i32_4 = arith.constant 0 : i32
    %6 = arith.cmpi ne, %5, %c0_i32_4 : i32
    scf.if %6 {
      %c0 = arith.constant 0 : index
      %c0_5 = arith.constant 0 : index
      %c0_6 = arith.constant 0 : index
      %7 = vector.load %arg4[%c0, %c0_5, %c0_6] : memref<14x8x128xf32, #tpu.memory_space<vmem>>, vector<14x8x128xf32>
      %cst = arith.constant dense<0.000000e+00> : vector<14x128xf32>
      %8 = vector.multi_reduction <add>, %7, %cst [1] : vector<14x8x128xf32> to vector<14x128xf32>
      %c0_7 = arith.constant 0 : index
      %c0_8 = arith.constant 0 : index
      %c0_9 = arith.constant 0 : index
      %9 = vector.load %arg3[%c0_7, %c0_8, %c0_9] : memref<1x14x128xf32, #tpu.memory_space<vmem>>, vector<1x14x128xf32>
      %10 = vector.shape_cast %9 : vector<1x14x128xf32> to vector<14x128xf32>
      %11 = vector.shape_cast %8 : vector<14x128xf32> to vector<1x14x128xf32>
      tpu.vector_store %arg3[%c0_7, %c0_8, %c0_9], %11 {strides = array<i32>} : memref<1x14x128xf32, #tpu.memory_space<vmem>>, vector<1x14x128xf32>,
    } else {
    }
    return
  }
  func.func @transform_0(%arg0: i32, %arg1: i32) -> (i32, i32, i32) {
    %c1_i32 = arith.constant 1 : i32
    %0 = arith.muli %arg0, %c1_i32 : i32
    %1 = arith.addi %0, %arg1 : i32
    %c0_i32 = arith.constant 0 : i32
    %c0_i32_0 = arith.constant 0 : i32
    %c0_i32_1 = arith.constant 0 : i32
    return %c0_i32, %1, %c0_i32_0 : i32, i32, i32
  }
  func.func @transform_1(%arg0: i32, %arg1: i32) -> (i32, i32, i32) {
    %c0_i32 = arith.constant 0 : i32
    %c0_i32_0 = arith.constant 0 : i32
    %c0_i32_1 = arith.constant 0 : i32
    return %arg0, %c0_i32, %c0_i32_0 : i32, i32, i32
  }
}

</mosaic_0001>

<bundles_post_ra>
// kernel: tpu_custom_call.1
= control target key start
LH: loop header
LB: loop body
LE: loop exit
PB: predicated region body
PF: predicated region fallthrough
CT: control target
= control target key end

     0   :  { %6 = vsyncpa [#allocation4], 0  ;;  %s1102_s0 = inlined_call_operand.hbm [shape: f32[25,32,128], index: 0, kind: input, shape index: {}]   ;;  %s1103_s1 = inlined_call_operand.vmem [shape: f32[2,14,128], index: 1, kind: output, shape index: {}]  }
   0x1   :  { %8 = vsyncpa [#allocation4 + $0x1], 0  ;;  %s913_s6 = smov 0   ;;  %s915_s7 = smov 0  }
   0x2   :  { %s917_s8 = smov 0   ;;  %s919_s9 = smov 0  }
   0x3   :  { %s921_s10 = smov 0   ;;  %s923_s11 = smov 0  }
   0x4 LB: > { %s695_s12 = sadd.s32 4294967295, %s889_s11   ;;  %s26_s13 = sadd.s32 1, %s885_s10  ;;  %s889_s11 = sphi %s923_s11, %s14_s11   ;;  %s885_s10 = sphi %s921_s10, %s1110_s10   ;;  %s881_s9 = sphi %s919_s9, %s1109_s9   ;;  %s877_s8 = sphi %s917_s8, %s1108_s8   ;;  %s873_s7 = sphi %s915_s7, %s1107_s7   ;;  %s869_s6 = sphi %s913_s6, %s1106_s6  }
   0x5   : > { %p28_p0 = scmp.ge.s32.totalorder %s26_s13, 2  ;;  %s35_s14 = sadd.s32 1, %s877_s8 }
   0x6   : > { %p42_p1 = scmp.ne.s32.totalorder %s877_s8, %s873_s7  ;;  %p43_p2 = scmp.eq.s32.totalorder %s889_s11, 0 }
   0x7   : > { %s1112_s13 = smov (%p28_p0, %s26_s13), 0  ;;  %p48_p4 = scmp.ne.s32.totalorder %s873_s7, %s869_s6 }
   0x8   : > { %p949_p3 = por %p43_p2, %p42_p1  ;;  %s32_s16 = ssub.s32 %s885_s10, %s1112_s13 }
   0x9   : > { %p49_p5 = scmp.eq.s32.totalorder %s695_s12, 0  ;;  %p33_p6 = scmp.eq.s32.totalorder %s32_s16, 0 }
   0xa   : > { %p698_p8 = scmp.ge.s32.totalorder %s889_s11, 2 }
   0xb   : > { %p956_p7 = por %p49_p5, %p48_p4 }
   0xc   : > { %s961_s18 = scalar_select %p33_p6, %s877_s8, %s35_s14  }
   0xd   : > { %94 = sbr.rel (%p698_p8) target bundleno = 32 (0x20), region = 16 }
  0x12   : > { %s98_s19 = sand.u32 1, %s877_s8   ;;  %s758_s20 = sshll.u32 %s885_s10, 4 }
  0x13   : > { %s760_s21 = smul.u32 400, %s98_s19  ;;  %s108_s24 = scalar_lea.hbm %s1102_s0, %s758_s20 }
  0x14   : > { %s121_s25 = sshll.u32 %s108_s24, 4  ;;  %s895_s30 = smov 512   ;;  %s122_s25 = int_to_ptr.hbm [resolvable:$true] %s121_s25 }
  0x15   : > { %s762_s26 = scalar_select %p949_p3, [#allocation0], [#allocation7] }
  0x16   : > { %s102_s27 = scalar_lea.vmem [#allocation3], %s760_s21  ;;  %763 = sst [smem:[#allocation6]] (%p949_p3), %s895_s30 }
  0x17   : > { %s123_s28 = sshll.u32 %s102_s27, 4  ;;  %s113_s29 = sld [smem:[%s762_s26]]   ;;  %s124_s28 = int_to_ptr.vmem [resolvable:$true] %s123_s28 }
  0x18   : > { %s896_s2 = smov 256   ;;  %s897_s3 = smov 2  }
  0x19   : > { %764 = sst [smem:[#allocation6 + $0x1]] (%p949_p3), %s896_s2  ;;  %s898_s4 = smov 128  }
  0x1a   : > { %765 = sst [smem:[#allocation6 + $0x2]] (%p949_p3), %s897_s3  ;;  %s899_s6 = smov 8  }
  0x1b   : > { %766 = sst [smem:[#allocation6 + $0x3]] (%p949_p3), %s898_s4  ;;  %s99_s14 = scalar_lea.sflag [#allocation4], %s98_s19 }
  0x1c   : > { %767 = sst [smem:[#allocation6 + $0x4]] (%p949_p3), %s898_s4  ;;  %s900_s16 = smov [#allocation5]  }
  0x1d   : > { %s701_s5 = sshll.u32 %s113_s29, 26  ;;  %768 = sst [smem:[#allocation6 + $0x5]] (%p949_p3), %s899_s6 }
  0x1e   : > { %s702_s12 = sadd.s32 134217728, %s701_s5 }
  0x1f   : > { %769 = dma.general (%p949_p3), %s122_s25, 6400, %s124_s28, %s99_s14, %s900_s16, [#allocation6], %s702_s12, 0  }
  0x20 PF: > { %p703_p9 = scmp.ge.s32.totalorder %s889_s11, 1  ;;  %p144_p10 = scmp.lt.s32.totalorder %s889_s11, 3 }
  0x22   : > { %p145_p11 = pnand %p703_p9, %p144_p10 }
  0x23   : > { %s150_s20 = sand.u32 (!%p145_p11), 1, %s873_s7  }
  0x24   : > { %148 = sbr.rel (%p145_p11) target bundleno = 114 (0x72), region = 24  ;;  %s151_s22 = scalar_lea.sflag (!%p145_p11), [#allocation4], %s150_s20 }
  0x25   : > { %s988_s21 = smul.u32 (!%p145_p11), 400, %s150_s20 }
  0x27   : > { %s154_s23 = scalar_lea.vmem (!%p145_p11), [#allocation3], %s988_s21 }
  0x29   : > { %864 = dma.done.wait (%p956_p7), %s151_s22, 6400  }
  0x2a   : > { %866 = vsyncadd (%p956_p7), %s151_s22, 4294960896  ;;  %p176_p12 = scmp.lt.s32.totalorder %s881_s9, 1  ;;  %v901_v0 = vmov 0.0   ;;  %s1002_s17 = smov 0  }
  0x2b   : > { %185 = vst [vmem:[#allocation2 + $0x30] sm:$0xff] %v901_v0 }
  0x2c   : > { %s1114_s9 = smov (!%p176_p12, %s881_s9), 1  ;;  %186 = vst [vmem:[#allocation2] sm:$0xff] %v901_v0 }
  0x2d   : > { %187 = vst [vmem:[#allocation2 + $0x58] sm:$0xff] %v901_v0  ;;  %s759_s15 = sshll.u32 %s1114_s9, 4 }
  0x2e   : > { %188 = vst [vmem:[#allocation2 + $0x18] sm:$0xff] %v901_v0  ;;  %s1000_s25 = scalar_lea.vmem %s1103_s1, %s759_s15 }
  0x2f   : > { %189 = vst [vmem:[#allocation2 + $0x50] sm:$0xff] %v901_v0 }
  0x30   : > { %190 = vst [vmem:[#allocation2 + $0x68] sm:$0xff] %v901_v0 }
  0x31   : > { %191 = vst [vmem:[#allocation2 + $0x8] sm:$0xff] %v901_v0 }
  0x32   : > { %192 = vst [vmem:[#allocation2 + $0x48] sm:$0xff] %v901_v0 }
  0x33   : > { %193 = vst [vmem:[#allocation2 + $0x40] sm:$0xff] %v901_v0 }
  0x34   : > { %194 = vst [vmem:[#allocation2 + $0x20] sm:$0xff] %v901_v0 }
  0x35   : > { %195 = vst [vmem:[#allocation2 + $0x10] sm:$0xff] %v901_v0 }
  0x36   : > { %196 = vst [vmem:[#allocation2 + $0x38] sm:$0xff] %v901_v0 }
  0x37   : > { %197 = vst [vmem:[#allocation2 + $0x60] sm:$0xff] %v901_v0 }
  0x38   : > { %198 = vst [vmem:[#allocation2 + $0x28] sm:$0xff] %v901_v0 }
  0x39 LB: >> { %s706_s9 = sshll.u32 %s893_s17, 3  ;;  %v347_v1 = vld [vmem:[#allocation2 + $0x30] sm:$0xff]  ;;  %v902_v28 = vmov 0.0   ;;  %v359_v30 = vld [vmem:[#allocation2 + $0x18] sm:$0xff]  ;;  %v351_v48 = vld [vmem:[#allocation2] sm:$0xff]  ;;  %s204_s17 = sadd.s32 1, %s893_s17   ;;  %s893_s17 = sphi %s1002_s17, %s204_s17  }
  0x3a   : >> { %s1010_s26 = scalar_lea.vmem %s154_s23, %s706_s9 [#allocation3]  ;;  %v379_v47 = vld [vmem:[#allocation2 + $0x40] sm:$0xff]  ;;  %v363_v50 = vld [vmem:[#allocation2 + $0x50] sm:$0xff]  ;;  %v355_v55 = vld [vmem:[#allocation2 + $0x58] sm:$0xff]  ;;  %p201_p13 = scmp.ge.s32.totalorder %s204_s17, 2  }
  0x3b   : >> { %v207_v2 = vld [vmem:[%s1010_s26] sm:$0xff]  ;;  %v1017_v4 = vld [vmem:[%s1010_s26 + $0xb0] sm:$0xff]  ;;  %v367_v57 = vld [vmem:[#allocation2 + $0x68] sm:$0xff]  ;;  %vm517_vm1 = vcmask (%p201_p13), 1041409   ;;  %vm519_vm2 = vcmask (%p201_p13), 1042434   ;;  %vm521_vm3 = vcmask (%p201_p13), 1043459  }
  0x3c   : >> { %v1014_v3 = vld [vmem:[%s1010_s26 + $0xa0] sm:$0xff]  ;;  %v348_v5 = vadd.f32 %v347_v1, %v207_v2  ;;  %v721_v7 = vld [vmem:[%s1010_s26 + $0xd0] sm:$0xff]  ;;  %vm523_vm4 = vcmask (%p201_p13), 1044484   ;;  %vm525_vm5 = vcmask (%p201_p13), 1045509   ;;  %vm527_vm6 = vcmask (%p201_p13), 1046534  }
  0x3d   : >> { %v1020_v6 = vld [vmem:[%s1010_s26 + $0xc0] sm:$0xff]  ;;  %v238_v9 = vsub.f32 %v721_v7, %v1014_v3  ;;  %v725_v11 = vld [vmem:[%s1010_s26 + $0xf0] sm:$0xff]  ;;  %vm529_vm7 = vcmask (%p201_p13), 1047559  }
  0x3e   : >> { %v723_v8 = vld [vmem:[%s1010_s26 + $0xe0] sm:$0xff]  ;;  %v729_v13 = vld [vmem:[%s1010_s26 + $0x110] sm:$0xff]  ;;  %349 = vst [vmem:[#allocation2 + $0x30] sm:$0xff] %v348_v5  ;;  %v249_v14 = vsub.f32 %v725_v11, %v1020_v6 }
  0x3f   : >> { %v243_v10 = vsub.f32 %v723_v8, %v1017_v4  ;;  %v727_v12 = vld [vmem:[%s1010_s26 + $0x100] sm:$0xff]  ;;  %v260_v16 = vsub.f32 %v729_v13, %v1017_v4  ;;  %v1034_v18 = vld [vmem:[%s1010_s26 + $0x30] sm:$0xff]  ;;  %v239_v20 = vmul.f32 %v238_v9, %v238_v9 }
  0x40   : >> { %v255_v15 = vsub.f32 %v727_v12, %v1014_v3  ;;  %v731_v17 = vld [vmem:[%s1010_s26 + $0x120] sm:$0xff]  ;;  %vm217_vm0 = vcmp.gt.f32.partialorder %v1034_v18, 0.0  ;;  %v747_v23 = vld [vmem:[%s1010_s26 + $0x50] sm:$0xff]  ;;  %v250_v25 = vmul.f32 %v249_v14, %v249_v14 }
  0x41   : >> { %v745_v19 = vld [vmem:[%s1010_s26 + $0x40] sm:$0xff]  ;;  %v244_v21 = vmul.f32 %v243_v10, %v243_v10  ;;  %v266_v22 = vsub.f32 %v731_v17, %v1020_v6  ;;  %v261_v27 = vmul.f32 %v260_v16, %v260_v16  ;;  %v713_v29 = vsel %vm217_vm0, 1.0, %v902_v28  ;;  %v755_v32 = vld [vmem:[%s1010_s26 + $0x90] sm:$0xff]  ;;  %v391_v28 = vld [vmem:[#allocation2 + $0x38] sm:$0xff] }
  0x42   : >> { %v1041_v24 = vld [vmem:[%s1010_s26 + $0x20] sm:$0xff]  ;;  %v256_v26 = vmul.f32 %v255_v15, %v255_v15  ;;  %v220_v35 = vmul.f32 %v713_v29, %v207_v2  ;;  %v306_v36 = vsub.f32 %v745_v19, %v1034_v18  ;;  %v310_v38 = vsub.f32 %v747_v23, %v1034_v18  ;;  %v733_v41 = vld [vmem:[%s1010_s26 + $0x130] sm:$0xff]  ;;  %v375_v23 = vld [vmem:[#allocation2 + $0x48] sm:$0xff] }
  0x43   : >> { %v753_v31 = vld [vmem:[%s1010_s26 + $0x80] sm:$0xff]  ;;  %v245_v33 = vadd.f32 %v244_v21, %v239_v20  ;;  %v267_v34 = vmul.f32 %v266_v22, %v266_v22  ;;  %v223_v39 = vmul.f32 %v1041_v24, %v207_v2  ;;  %v708_v45 = vld [vmem:[%s1010_s26 + $0x10] sm:$0xff]  ;;  %v328_v46 = vmax.f32 %v755_v32, 0.0 }
  0x44   : >> { %v262_v37 = vadd.f32 %v261_v27, %v256_v26  ;;  %v322_v40 = vmax.f32 %v753_v31, 0.0  ;;  %v360_v43 = vadd.f32 %v359_v30, %v220_v35  ;;  %v333_v44 = vmul.f32 %v306_v36, %v220_v35  ;;  %v735_v0 = vld [vmem:[%s1010_s26 + $0x140] sm:$0xff]  ;;  %v737_v1 = vld [vmem:[%s1010_s26 + $0x150] sm:$0xff] }
  0x45   : >> { %v251_v42 = vadd.f32 %v250_v25, %v245_v33  ;;  %v335_v51 = vmul.f32 %v310_v38, %v220_v35  ;;  %v221_v53 = vmul.f32 %v708_v45, %v207_v2  ;;  %v329_v58 = vmin.f32 %v328_v46, 1.0  ;;  %v739_v5 = vld [vmem:[%s1010_s26 + $0x160] sm:$0xff]  ;;  %v741_v11 = vld [vmem:[%s1010_s26 + $0x170] sm:$0xff] }
  0x46   : >> { %v268_v49 = vadd.f32 %v267_v34, %v262_v37  ;;  %v323_v52 = vmin.f32 %v322_v40, 1.0  ;;  %361 = vst [vmem:[#allocation2 + $0x18] sm:$0xff] %v360_v43  ;;  %v334_v56 = vmul.f32 %v333_v44, %v306_v36  ;;  %v272_v59 = vsub.f32 %v733_v41, %v1014_v3  ;;  %v743_v12 = vld [vmem:[%s1010_s26 + $0x180] sm:$0xff]  ;;  %v751_v34 = vld [vmem:[%s1010_s26 + $0x70] sm:$0xff] }
  0x47   : >> { %v331_v54 = vmul.f32 %v251_v42, %v207_v2  ;;  %v336_v61 = vmul.f32 %v335_v51, %v310_v38  ;;  %v380_v63 = vadd.f32 %v379_v47, %v221_v53  ;;  %v330_v9 = vsub.f32 %v329_v58, %v708_v45  ;;  %v749_v29 = vld [vmem:[%s1010_s26 + $0x60] sm:$0xff] }
  0x48   : >> { %v332_v60 = vmul.f32 %v268_v49, %v207_v2  ;;  %v324_v62 = vsub.f32 %v323_v52, %v708_v45  ;;  %v364_v8 = vadd.f32 %v363_v50, %v334_v56  ;;  %v224_v10 = vmul.f32 %v1041_v24, %v221_v53  ;;  %v371_v2 = vld [vmem:[#allocation2 + $0x8] sm:$0xff]  ;;  %v383_v44 = vld [vmem:[#allocation2 + $0x20] sm:$0xff]  ;;  %v387_v49 = vld [vmem:[#allocation2 + $0x10] sm:$0xff] }
  0x49   : >> { %v352_v7 = vadd.f32 %v351_v48, %v331_v54  ;;  %v368_v14 = vadd.f32 %v367_v57, %v336_v61  ;;  %381 = vst [vmem:[#allocation2 + $0x40] sm:$0xff] %v380_v63  ;;  %v273_v16 = vmul.f32 %v272_v59, %v272_v59  ;;  %v339_v17 = vmul.f32 %v330_v9, %v223_v39  ;;  %v395_v46 = vld [vmem:[#allocation2 + $0x60] sm:$0xff]  ;;  %v399_v50 = vld [vmem:[#allocation2 + $0x28] sm:$0xff] }
  0x4a   : >> { %v356_v13 = vadd.f32 %v355_v55, %v332_v60  ;;  %v337_v15 = vmul.f32 %v324_v62, %v223_v39  ;;  %v277_v19 = vsub.f32 %v735_v0, %v1017_v4  ;;  %v283_v20 = vsub.f32 %v737_v1, %v1020_v6  ;;  %365 = vst [vmem:[#allocation2 + $0x50] sm:$0xff] %v364_v8 }
  0x4b   : >> { %353 = vst [vmem:[#allocation2] sm:$0xff] %v352_v7  ;;  %v289_v21 = vsub.f32 %v739_v5, %v1014_v3  ;;  %v294_v25 = vsub.f32 %v741_v11, %v1017_v4  ;;  %v300_v26 = vsub.f32 %v743_v12, %v1020_v6  ;;  %v222_v27 = vmul.f32 %v708_v45, %v220_v35 }
  0x4c   : >> { %357 = vst [vmem:[#allocation2 + $0x58] sm:$0xff] %v356_v13  ;;  %v338_v22 = vmul.f32 %v337_v15, %v324_v62  ;;  %v340_v30 = vmul.f32 %v339_v17, %v330_v9  ;;  %v278_v31 = vmul.f32 %v277_v19, %v277_v19  ;;  %v284_v32 = vmul.f32 %v283_v20, %v283_v20 }
  0x4d   : >> { %v290_v33 = vmul.f32 %v289_v21, %v289_v21  ;;  %369 = vst [vmem:[#allocation2 + $0x68] sm:$0xff] %v368_v14  ;;  %v295_v37 = vmul.f32 %v294_v25, %v294_v25  ;;  %v301_v3 = vmul.f32 %v300_v26, %v300_v26  ;;  %v225_v38 = vmul.f32 %v1041_v24, %v222_v27  ;;  %v408_v59 = vld [vmem:[#allocation2 + $0x18] sm:$0xff] (%p201_p13) }
  0x4e   : >> { %v372_v36 = vadd.f32 %v371_v2, %v338_v22  ;;  %v376_v39 = vadd.f32 %v375_v23, %v340_v30  ;;  %v279_v40 = vadd.f32 %v278_v31, %v273_v16  ;;  %v392_v4 = vadd.f32 %v391_v28, %v222_v27 }
  0x4f   : >> { %v314_v6 = vsub.f32 %v749_v29, %v1034_v18  ;;  %v296_v35 = vadd.f32 %v295_v37, %v290_v33  ;;  %v318_v41 = vsub.f32 %v751_v34, %v1034_v18  ;;  %v405_v18 = vld [vmem:[#allocation2 + $0x30] sm:$0xff] (%p201_p13)  ;;  %v437_v7 = vrot.slane (%p201_p13), %v408_v59, 4 }
  0x50   : >> { %373 = vst [vmem:[#allocation2 + $0x8] sm:$0xff] %v372_v36  ;;  %v285_v42 = vadd.f32 %v284_v32, %v279_v40  ;;  %v419_v62 = vrot.slane (%p201_p13), %v405_v18, 4 }
  0x51   : >> { %377 = vst [vmem:[#allocation2 + $0x48] sm:$0xff] %v376_v39  ;;  %v343_v43 = vmul.f32 %v314_v6, %v225_v38  ;;  %v302_v45 = vadd.f32 %v301_v3, %v296_v35  ;;  %v345_v47 = vmul.f32 %v318_v41, %v225_v38  ;;  %v409_v60 = vld [vmem:[#allocation2 + $0x50] sm:$0xff] (%p201_p13)  ;;  %v438_v14 = vadd.f32 (%p201_p13), %v437_v7, %v408_v59 }
  0x52   : >> { %393 = vst [vmem:[#allocation2 + $0x38] sm:$0xff] %v392_v4  ;;  %v341_v48 = vmul.f32 %v285_v42, %v224_v10  ;;  %v406_v57 = vld [vmem:[#allocation2] sm:$0xff] (%p201_p13)  ;;  %v443_v8 = vrot.slane (%p201_p13), %v409_v60, 4 }
  0x53   : >> { %v344_v24 = vmul.f32 %v343_v43, %v314_v6  ;;  %v342_v51 = vmul.f32 %v302_v45, %v224_v10  ;;  %v346_v52 = vmul.f32 %v345_v47, %v318_v41  ;;  %v407_v58 = vld [vmem:[#allocation2 + $0x58] sm:$0xff] (%p201_p13)  ;;  %v425_v63 = vrot.slane (%p201_p13), %v406_v57, 4 }
  0x54   : >> { %v384_v53 = vadd.f32 %v383_v44, %v341_v48  ;;  %v410_v61 = vld [vmem:[#allocation2 + $0x68] sm:$0xff] (%p201_p13)  ;;  %v431_v0 = vrot.slane (%p201_p13), %v407_v58, 4  ;;  %v420_v10 = vadd.f32 (%p201_p13), %v419_v62, %v405_v18  ;;  %v444_v15 = vadd.f32 (%p201_p13), %v443_v8, %v409_v60  ;;  %v413_v44 = vld [vmem:[#allocation2 + $0x40] sm:$0xff] (%p201_p13) }
  0x55   : >> { %v396_v54 = vadd.f32 %v395_v46, %v344_v24  ;;  %v388_v55 = vadd.f32 %v387_v49, %v342_v51  ;;  %v400_v56 = vadd.f32 %v399_v50, %v346_v52  ;;  %203 = sbr.rel (!%p201_p13) target bundleno = 57 (0x39), region = 122  ;;  %v449_v9 = vrot.slane (%p201_p13), %v410_v61, 4 }
  0x56   : >> { %385 = vst [vmem:[#allocation2 + $0x20] sm:$0xff] %v384_v53  ;;  %v426_v11 = vadd.f32 (%p201_p13), %v425_v63, %v406_v57  ;;  %v432_v12 = vadd.f32 (%p201_p13), %v431_v0, %v407_v58  ;;  %v421_v17 = vrot.slane (%p201_p13), %v420_v10, 2  ;;  %v439_v22 = vrot.slane (%p201_p13), %v438_v14, 2 }
  0x57   : >> { %389 = vst [vmem:[#allocation2 + $0x10] sm:$0xff] %v388_v55  ;;  %v411_v1 = vld [vmem:[#allocation2 + $0x8] sm:$0xff] (%p201_p13)  ;;  %v450_v16 = vadd.f32 (%p201_p13), %v449_v9, %v410_v61  ;;  %v445_v23 = vrot.slane (%p201_p13), %v444_v15, 2  ;;  %v467_v18 = vrot.slane (%p201_p13), %v413_v44, 4 }
  0x58   : >> { %397 = vst [vmem:[#allocation2 + $0x60] sm:$0xff] %v396_v54  ;;  %v412_v5 = vld [vmem:[#allocation2 + $0x48] sm:$0xff] (%p201_p13)  ;;  %v455_v13 = vrot.slane (%p201_p13), %v411_v1, 4  ;;  %v427_v19 = vrot.slane (%p201_p13), %v426_v11, 2  ;;  %v433_v20 = vrot.slane (%p201_p13), %v432_v12, 2  ;;  %v422_v27 = vadd.f32 (%p201_p13), %v421_v17, %v420_v10 }
  0x59   : >> { %401 = vst [vmem:[#allocation2 + $0x28] sm:$0xff] %v400_v56  ;;  %v461_v2 = vrot.slane (%p201_p13), %v412_v5, 4  ;;  %v451_v25 = vrot.slane (%p201_p13), %v450_v16, 2  ;;  %v440_v31 = vadd.f32 (%p201_p13), %v439_v22, %v438_v14  ;;  %v446_v32 = vadd.f32 (%p201_p13), %v445_v23, %v444_v15  ;;  %v416_v50 = vld [vmem:[#allocation2 + $0x38] sm:$0xff] (%p201_p13) }
  0x5a   : > { %v456_v21 = vadd.f32 %v455_v13, %v411_v1  ;;  %v428_v28 = vadd.f32 %v427_v19, %v426_v11  ;;  %v434_v29 = vadd.f32 %v433_v20, %v432_v12  ;;  %v423_v36 = vrot.slane %v422_v27, 1 }
  0x5b   : > { %v462_v26 = vadd.f32 %v461_v2, %v412_v5  ;;  %v452_v33 = vadd.f32 %v451_v25, %v450_v16  ;;  %v441_v39 = vrot.slane %v440_v31, 1  ;;  %v447_v40 = vrot.slane %v446_v32, 1 }
  0x5c   : > { %v457_v30 = vrot.slane %v456_v21, 2  ;;  %v429_v37 = vrot.slane %v428_v28, 1  ;;  %v435_v3 = vrot.slane %v434_v29, 1  ;;  %v424_v35 = vadd.f32 %v423_v36, %v422_v27 }
  0x5d   : > { %v463_v34 = vrot.slane %v462_v26, 2  ;;  %v453_v4 = vrot.slane %v452_v33, 1  ;;  %v442_v45 = vadd.f32 %v441_v39, %v440_v31  ;;  %v448_v46 = vadd.f32 %v447_v40, %v446_v32  ;;  %v414_v49 = vld [vmem:[#allocation2 + $0x20] sm:$0xff] }
  0x5e   : > { %v458_v38 = vadd.f32 %v457_v30, %v456_v21  ;;  %v430_v41 = vadd.f32 %v429_v37, %v428_v28  ;;  %v436_v42 = vadd.f32 %v435_v3, %v434_v29  ;;  %v415_v24 = vld [vmem:[#allocation2 + $0x10] sm:$0xff]  ;;  %v473_v58 = vrot.slane %v414_v49, 4 }
  0x5f   : > { %v464_v6 = vadd.f32 %v463_v34, %v462_v26  ;;  %v454_v47 = vadd.f32 %v453_v4, %v452_v33  ;;  %v417_v53 = vld [vmem:[#allocation2 + $0x60] sm:$0xff]  ;;  %v479_v59 = vrot.slane %v415_v24, 4  ;;  %v485_v60 = vrot.slane %v416_v50, 4 }
  0x60   : > { %v459_v43 = vrot.slane %v458_v38, 1  ;;  %v518_v52 = vsel %vm517_vm1, %v430_v41, %v424_v35  ;;  %v418_v54 = vld [vmem:[#allocation2 + $0x28] sm:$0xff]  ;;  %v468_v62 = vadd.f32 %v467_v18, %v413_v44  ;;  %v491_v63 = vrot.slane %v417_v53, 4 }
  0x61   : > { %v465_v48 = vrot.slane %v464_v6, 1  ;;  %v520_v56 = vsel %vm519_vm2, %v436_v42, %v518_v52  ;;  %v497_v0 = vrot.slane %v418_v54, 4  ;;  %v474_v5 = vadd.f32 %v473_v58, %v414_v49 }
  0x62   : > { %v460_v51 = vadd.f32 %v459_v43, %v458_v38  ;;  %v522_v57 = vsel %vm521_vm3, %v442_v45, %v520_v56  ;;  %v480_v7 = vadd.f32 %v479_v59, %v415_v24  ;;  %v486_v8 = vadd.f32 %v485_v60, %v416_v50 }
  0x63   : > { %v466_v55 = vadd.f32 %v465_v48, %v464_v6  ;;  %v524_v61 = vsel %vm523_vm4, %v448_v46, %v522_v57  ;;  %v469_v10 = vrot.slane %v468_v62, 2  ;;  %v492_v11 = vadd.f32 %v491_v63, %v417_v53 }
  0x64   : > { %v526_v1 = vsel %vm525_vm5, %v454_v47, %v524_v61  ;;  %v498_v12 = vadd.f32 %v497_v0, %v418_v54  ;;  %v475_v14 = vrot.slane %v474_v5, 2  ;;  %v481_v15 = vrot.slane %v480_v7, 2 }
  0x65   : > { %v528_v9 = vsel %vm527_vm6, %v460_v51, %v526_v1  ;;  %v487_v16 = vrot.slane %v486_v8, 2  ;;  %v470_v2 = vadd.f32 %v469_v10, %v468_v62  ;;  %v493_v17 = vrot.slane %v492_v11, 2 }
  0x66   : > { %v530_v13 = vsel %vm529_vm7, %v466_v55, %v528_v9  ;;  %v499_v19 = vrot.slane %v498_v12, 2  ;;  %v476_v20 = vadd.f32 %v475_v14, %v474_v5  ;;  %v482_v21 = vadd.f32 %v481_v15, %v480_v7 }
  0x67   : > { %538 = vst [vmem:[%s1000_s25] sm:$0xff] %v530_v13  ;;  %v488_v22 = vadd.f32 %v487_v16, %v486_v8  ;;  %v471_v23 = vrot.slane %v470_v2, 1  ;;  %v494_v25 = vadd.f32 %v493_v17, %v492_v11 }
  0x68   : > { %v500_v26 = vadd.f32 %v499_v19, %v498_v12  ;;  %v477_v27 = vrot.slane %v476_v20, 1  ;;  %v483_v28 = vrot.slane %v482_v21, 1 }
  0x69   : > { %v489_v29 = vrot.slane %v488_v22, 1  ;;  %v472_v30 = vadd.f32 %v471_v23, %v470_v2  ;;  %v495_v31 = vrot.slane %v494_v25, 1 }
  0x6a   : > { %v501_v32 = vrot.slane %v500_v26, 1  ;;  %v478_v33 = vadd.f32 %v477_v27, %v476_v20  ;;  %v484_v34 = vadd.f32 %v483_v28, %v482_v21 }
  0x6b   : > { %v490_v36 = vadd.f32 %v489_v29, %v488_v22  ;;  %v496_v37 = vadd.f32 %v495_v31, %v494_v25 }
  0x6c   : > { %v502_v3 = vadd.f32 %v501_v32, %v500_v26  ;;  %v531_v38 = vsel %vm517_vm1, %v478_v33, %v472_v30 }
  0x6d   : > { %v532_v39 = vsel %vm519_vm2, %v484_v34, %v531_v38 }
  0x6e   : > { %v533_v40 = vsel %vm521_vm3, %v490_v36, %v532_v39 }
  0x6f   : > { %v534_v4 = vsel %vm523_vm4, %v496_v37, %v533_v40 }
  0x70   : > { %v535_v6 = vsel %vm525_vm5, %v502_v3, %v534_v4 }
  0x71   : > { %539 = vst [vmem:[%s1000_s25 + $0x8] sm:$0x3f] %v535_v6 }
  0x72 PF: > { %s14_s11 = sadd.s32 1, %s889_s11   ;;  %s1106_s6 = smov %s873_s7 }
  0x73   : > { %p11_p0 = scmp.ge.s32.totalorder %s14_s11, 4   ;;  %s1107_s7 = smov %s877_s8 }
  0x74   : > { %s1108_s8 = smov %s961_s18  ;;  %s1109_s9 = smov %s885_s10 }
  0x75   : > { %s1110_s10 = smov %s1112_s13  ;;  %13 = sbr.rel (!%p11_p0) target bundleno = 4 (0x4), region = 133 }
  0x7a   :  { %561 = vsyncpa [#allocation4], 1 }
  0x7b   :  { %563 = vsyncpa [#allocation4 + $0x1], 1 }

</bundles_post_ra>
